<compile_context>
chip_gen: v6e
topology: v6e:2x2x1
jax: 0.10.0
libtpu: 0.0.40
codegen_flags: <defaults>
</compile_context>

<pallas_src>
import math

import jax
import jax.numpy as jnp
from jax.experimental import pallas as pl
from jax.experimental.pallas import tpu as pltpu

EPS = 1e-20
_LANES = 128
_MAX_TP = 1024   # lane-tile for P; comfortable for double-buffering on all chips


def _round_up(x, m):
    return ((x + m - 1) // m) * m


# -----------------------------------------------------------------------------
# Pallas kernel: normalized convolution (NConv2d.forward) on one (K, TP) tile.
# -----------------------------------------------------------------------------
def _nconv_kernel(cp_ref, dp_ref, w_ref, b_ref, wsinv_ref, nconv_ref, cout_ref):
    cp = cp_ref[0]                                    # (K, TP)  conf patches
    dp = dp_ref[0]                                    # (K, TP)  (data*conf) patches
    w = w_ref[...]                                    # (Cout, K)
    tp = cp.shape[-1]

    # Fused MXU dot: one weight push covers both the denominator (conf) and
    # numerator (data*conf) convolutions.
    rhs = jnp.concatenate([cp, dp], axis=-1)          # (K, 2*TP)
    prod = jnp.dot(w, rhs, preferred_element_type=jnp.float32)   # (Cout, 2*TP)
    denom = prod[:, :tp]
    nomin = prod[:, tp:]

    inv = pl.reciprocal(denom + EPS)                  # exact 1/x, then multiply
    nconv_ref[0] = nomin * inv + b_ref[...]           # bias (Cout,1) lane-broadcast
    cout_ref[0] = denom * wsinv_ref[...]              # precomputed 1/sum(W) per ch


def _im2col_kp(x_p, KH, KW, Hout, Wout):
    """(B, C, Hp, Wp) -> (B, C*KH*KW, Hout*Wout); feature order (ci, kh, kw)
    matches weight.reshape(Cout, Cin*KH*KW)."""
    B, C = x_p.shape[0], x_p.shape[1]
    if KH == 1 and KW == 1:
        # 1x1 conv: no patch amplification at all, just a reshape.
        return x_p.reshape(B, C, Hout * Wout)
    cols = [x_p[:, :, kh:kh + Hout, kw:kw + Wout]
            for kh in range(KH) for kw in range(KW)]
    pat = jnp.stack(cols, axis=2)                     # (B, C, KH*KW, Hout, Wout)
    return pat.reshape(B, C * KH * KW, Hout * Wout)


def nconv2d(layer, data, conf):
    """NConv2d.forward: returns (nconv, cout), both NCHW float32."""
    weight, bias, padding = layer["weight"], layer["bias"], layer["padding"]
    B, Cin, H, W = data.shape
    Cout, _, KH, KW = weight.shape
    ph, pw = padding
    Hout = H + 2 * ph - KH + 1
    Wout = W + 2 * pw - KW + 1
    P = Hout * Wout
    K = Cin * KH * KW

    pad = ((0, 0), (0, 0), (ph, ph), (pw, pw))
    conf_p = jnp.pad(conf, pad)
    # data*conf on the raw (B,Cin,H,W) tensor, *before* patch extraction.
    dc_p = jnp.pad(data * conf, pad)

    conf_pat = _im2col_kp(conf_p, KH, KW, Hout, Wout)   # (B, K, P)
    dc_pat = _im2col_kp(dc_p, KH, KW, Hout, Wout)       # (B, K, P)

    # Lane-dense tiling of the pixel axis.
    TP = min(_MAX_TP, _round_up(P, _LANES))
    Pp = _round_up(P, TP)
    if Pp != P:
        conf_pat = jnp.pad(conf_pat, ((0, 0), (0, 0), (0, Pp - P)))
        dc_pat = jnp.pad(dc_pat, ((0, 0), (0, 0), (0, Pp - P)))

    w2 = weight.reshape(Cout, K)                              # (Cout, K)
    ws_inv = (1.0 / jnp.sum(w2, axis=1)).reshape(Cout, 1)     # (Cout, 1)
    b2 = bias.reshape(Cout, 1)                                # (Cout, 1)

    grid = (B, Pp // TP)
    nconv, cout = pl.pallas_call(
        _nconv_kernel,
        out_shape=(jax.ShapeDtypeStruct((B, Cout, Pp), jnp.float32),
                   jax.ShapeDtypeStruct((B, Cout, Pp), jnp.float32)),
        grid=grid,
        in_specs=[pl.BlockSpec((1, K, TP), lambda b, p: (b, 0, p)),
                  pl.BlockSpec((1, K, TP), lambda b, p: (b, 0, p)),
                  pl.BlockSpec((Cout, K), lambda b, p: (0, 0)),
                  pl.BlockSpec((Cout, 1), lambda b, p: (0, 0)),
                  pl.BlockSpec((Cout, 1), lambda b, p: (0, 0))],
        out_specs=(pl.BlockSpec((1, Cout, TP), lambda b, p: (b, 0, p)),
                   pl.BlockSpec((1, Cout, TP), lambda b, p: (b, 0, p))),
        compiler_params=pltpu.CompilerParams(
            dimension_semantics=("parallel", "parallel")),
    )(conf_pat, dc_pat, w2, b2, ws_inv)

    # Already channel-first: just drop the lane padding and unflatten spatial.
    nconv = nconv[:, :, :P].reshape(B, Cout, Hout, Wout)
    cout = cout[:, :, :P].reshape(B, Cout, Hout, Wout)
    return nconv, cout


# -----------------------------------------------------------------------------
# Glue ops (pooling with confidence-argmax gather, nearest upsample).
# -----------------------------------------------------------------------------
def _maxpool_gather(c, x, ds=2):
    # F.max_pool2d(c, ds, ds, return_indices=True) + gather of x at those indices.
    B, C, H, W = c.shape

    def win(a):
        return (a.reshape(B, C, H // ds, ds, W // ds, ds)
                 .transpose(0, 1, 2, 4, 3, 5)
                 .reshape(B, C, H // ds, W // ds, ds * ds))

    cw, xw = win(c), win(x)
    idx = jnp.argmax(cw, axis=-1)
    c_ds = jnp.take_along_axis(cw, idx[..., None], axis=-1)[..., 0]
    x_ds = jnp.take_along_axis(xw, idx[..., None], axis=-1)[..., 0]
    return c_ds, x_ds


def _upsample2(x):
    # F.interpolate(mode='nearest') to exactly 2x spatial size.
    return jnp.repeat(jnp.repeat(x, 2, axis=2), 2, axis=3)


# -----------------------------------------------------------------------------
# Deterministic parameter initialization (shapes from NConv2d.__init__).
# -----------------------------------------------------------------------------
def _poisson_pmf(k):
    mu = k / 2.0
    return jnp.array([math.exp(-mu) * mu ** i / math.factorial(i) for i in range(k)],
                     jnp.float32)


def _init_nconv(key, cin, cout, ksize, method, padding):
    kh, kw = ksize
    if method == "p":
        pmf = _poisson_pmf(kh)
        w2d = jnp.outer(pmf, pmf)                                  # (kh, kw)
        base = jnp.broadcast_to(w2d, (cout, cin, kh, kw))
        weight = base + jax.random.uniform(key, (cout, cin, kh, kw), jnp.float32)
    else:  # 'k' -> kaiming uniform
        fan_in = cin * kh * kw
        bound = math.sqrt(6.0 / fan_in)
        weight = jax.random.uniform(key, (cout, cin, kh, kw), jnp.float32,
                                    minval=-bound, maxval=bound)
    bias = jnp.full((cout,), 0.01, jnp.float32)
    return {"weight": weight, "bias": bias, "padding": padding}


def init_params(key):
    ks = jax.random.split(key, 7)
    nc = 8
    return {
        "nconv1": _init_nconv(ks[0], 1, nc, (5, 5), "p", (2, 2)),
        "nconv2": _init_nconv(ks[1], nc, nc, (5, 5), "p", (2, 2)),
        "nconv3": _init_nconv(ks[2], nc, nc, (5, 5), "p", (2, 2)),
        "nconv4": _init_nconv(ks[3], 2 * nc, nc, (3, 3), "p", (1, 1)),
        "nconv5": _init_nconv(ks[4], 2 * nc, nc, (3, 3), "p", (1, 1)),
        "nconv6": _init_nconv(ks[5], 2 * nc, nc, (3, 3), "p", (0, 0)),
        # second nconv7 definition overrides the first; default padding=(2,2)
        "nconv7": _init_nconv(ks[6], nc, 1, (1, 1), "k", (2, 2)),
    }


# -----------------------------------------------------------------------------
# DNET.forward
# -----------------------------------------------------------------------------
def dnet_forward(params, fout, S, K):
    del fout, K  # unused in the reference forward
    c0 = (S > 0.01).astype(jnp.float32)
    x0 = S

    x1, c1 = nconv2d(params["nconv1"], x0, c0)
    x1, c1 = nconv2d(params["nconv2"], x1, c1)
    x1, c1 = nconv2d(params["nconv3"], x1, c1)

    c1_ds, x1_ds = _maxpool_gather(c1, x1)
    c1_ds = c1_ds / 4

    x2_ds, c2_ds = nconv2d(params["nconv2"], x1_ds, c1_ds)
    x2_ds, c2_ds = nconv2d(params["nconv3"], x2_ds, c2_ds)

    c2_dss, x2_dss = _maxpool_gather(c2_ds, x2_ds)
    c2_dss = c2_dss / 4

    x3_ds, c3_ds = nconv2d(params["nconv2"], x2_dss, c2_dss)

    c3_dss, x3_dss = _maxpool_gather(c3_ds, x3_ds)
    c3_dss = c3_dss / 4

    x4_ds, c4_ds = nconv2d(params["nconv2"], x3_dss, c3_dss)

    x4 = _upsample2(x4_ds)
    c4 = _upsample2(c4_ds)
    x34_ds, c34_ds = nconv2d(params["nconv4"],
                             jnp.concatenate([x3_ds, x4], axis=1),
                             jnp.concatenate([c3_ds, c4], axis=1))

    x34 = _upsample2(x34_ds)
    c34 = _upsample2(c34_ds)
    x23_ds, c23_ds = nconv2d(params["nconv5"],
                             jnp.concatenate([x2_ds, x34], axis=1),
                             jnp.concatenate([c2_ds, c34], axis=1))

    x23 = _upsample2(x23_ds)
    c23 = _upsample2(c23_ds)
    xout, cout = nconv2d(params["nconv6"],
                         jnp.concatenate([x23, x1], axis=1),
                         jnp.concatenate([c23, c1], axis=1))

    xout, cout = nconv2d(params["nconv7"], xout, cout)
    # PyTorch slices [1:481, 1:641]; at small shapes this clips like numpy.
    return xout[:, :, 1:481, 1:641], cout[:, :, 1:481, 1:641]


if __name__ == "__main__":
    key = jax.random.PRNGKey(0)
    pkey, skey = jax.random.split(key)
    params = init_params(pkey)

    B, H, W = 2, 32, 32          # spatial divisible by 8 (three 2x poolings)
    S = jax.random.uniform(skey, (B, 1, H, W), jnp.float32)
    fout = jnp.zeros((B, 1, H, W), jnp.float32)   # unused by forward
    Kmat = jnp.zeros((B, 1, H, W), jnp.float32)   # unused by forward

    xout, cout = dnet_forward(params, fout, S, Kmat)
    jax.block_until_ready((xout, cout))
    print("KERNEL_OK")
</pallas_src>

<mosaic_0001>
module attributes {stable_mosaic.version = 11 : i64} {
  func.func @_nconv_kernel(%arg0: i32, %arg1: i32, %arg2: memref<1x25x1024xf32, #tpu.memory_space<vmem>>, %arg3: memref<1x25x1024xf32, #tpu.memory_space<vmem>>, %arg4: memref<8x25xf32, #tpu.memory_space<vmem>>, %arg5: memref<8x1xf32, #tpu.memory_space<vmem>>, %arg6: memref<8x1xf32, #tpu.memory_space<vmem>>, %arg7: memref<1x8x1024xf32, #tpu.memory_space<vmem>>, %arg8: memref<1x8x1024xf32, #tpu.memory_space<vmem>>) attributes {dimension_semantics = [#tpu.dimension_semantics<parallel>, #tpu.dimension_semantics<parallel>], iteration_bounds = array<i64: 2, 1>, scalar_prefetch = 0 : i64, scratch_operands = 0 : i64, tpu.core_type = #tpu.core_type<tc>, window_params = [{transform_indices = @transform_0, window_bounds = array<i64: 1, 25, 1024>}, {transform_indices = @transform_1, window_bounds = array<i64: 1, 25, 1024>}, {pipeline_mode = #tpu.pipeline_mode<synchronous>, transform_indices = @transform_2, window_bounds = array<i64: 8, 25>}, {pipeline_mode = #tpu.pipeline_mode<synchronous>, transform_indices = @transform_3, window_bounds = array<i64: 8, 1>}, {pipeline_mode = #tpu.pipeline_mode<synchronous>, transform_indices = @transform_4, window_bounds = array<i64: 8, 1>}, {transform_indices = @transform_5, window_bounds = array<i64: 1, 8, 1024>}, {transform_indices = @transform_6, window_bounds = array<i64: 1, 8, 1024>}]} {
    %c0 = arith.constant 0 : index
    %c0_0 = arith.constant 0 : index
    %c0_1 = arith.constant 0 : index
    %0 = vector.load %arg2[%c0, %c0_0, %c0_1] : memref<1x25x1024xf32, #tpu.memory_space<vmem>>, vector<1x25x1024xf32>
    %1 = vector.shape_cast %0 : vector<1x25x1024xf32> to vector<25x1024xf32>
    %c0_2 = arith.constant 0 : index
    %c0_3 = arith.constant 0 : index
    %c0_4 = arith.constant 0 : index
    %2 = vector.load %arg3[%c0_2, %c0_3, %c0_4] : memref<1x25x1024xf32, #tpu.memory_space<vmem>>, vector<1x25x1024xf32>
    %3 = vector.shape_cast %2 : vector<1x25x1024xf32> to vector<25x1024xf32>
    %c0_5 = arith.constant 0 : index
    %c0_6 = arith.constant 0 : index
    %4 = vector.load %arg4[%c0_5, %c0_6] : memref<8x25xf32, #tpu.memory_space<vmem>>, vector<8x25xf32>
    %5 = tpu.concatenate %1, %3 in 1 : vector<25x1024xf32>, vector<25x1024xf32> -> vector<25x2048xf32>
    %cst = arith.constant dense<0.000000e+00> : vector<8x2048xf32>
    %6 = tpu.matmul %4, %5, %cst {dimension_numbers = #tpu.dot_dimension_numbers<[1], [0], [0], [1], [0, 0, 1, 1], [], []>} : vector<8x25xf32>, vector<25x2048xf32>, vector<8x2048xf32> -> vector<8x2048xf32>
    %7 = vector.extract_strided_slice %6 {offsets = [0, 0], sizes = [8, 1024], strides = [1, 1]} : vector<8x2048xf32> to vector<8x1024xf32>
    %8 = vector.extract_strided_slice %6 {offsets = [0, 1024], sizes = [8, 1024], strides = [1, 1]} : vector<8x2048xf32> to vector<8x1024xf32>
    %cst_7 = arith.constant 9.99999968E-21 : f32
    %9 = vector.broadcast %cst_7 : f32 to vector<8x1024xf32>
    %10 = arith.addf %7, %9 : vector<8x1024xf32>
    %11 = tpu.reciprocal %10 : vector<8x1024xf32> -> vector<8x1024xf32>
    %12 = arith.mulf %8, %11 : vector<8x1024xf32>
    %c0_8 = arith.constant 0 : index
    %c0_9 = arith.constant 0 : index
    %13 = vector.load %arg5[%c0_8, %c0_9] : memref<8x1xf32, #tpu.memory_space<vmem>>, vector<8x1xf32>
    %14 = vector.broadcast %13 : vector<8x1xf32> to vector<8x1024xf32>
    %15 = arith.addf %12, %14 : vector<8x1024xf32>
    %c0_10 = arith.constant 0 : index
    %c0_11 = arith.constant 0 : index
    %c0_12 = arith.constant 0 : index
    %16 = vector.load %arg7[%c0_10, %c0_11, %c0_12] : memref<1x8x1024xf32, #tpu.memory_space<vmem>>, vector<1x8x1024xf32>
    %17 = vector.shape_cast %16 : vector<1x8x1024xf32> to vector<8x1024xf32>
    %18 = vector.shape_cast %15 : vector<8x1024xf32> to vector<1x8x1024xf32>
    tpu.vector_store %arg7[%c0_10, %c0_11, %c0_12], %18 {strides = array<i32>} : memref<1x8x1024xf32, #tpu.memory_space<vmem>>, vector<1x8x1024xf32>,
    %c0_13 = arith.constant 0 : index
    %c0_14 = arith.constant 0 : index
    %19 = vector.load %arg6[%c0_13, %c0_14] : memref<8x1xf32, #tpu.memory_space<vmem>>, vector<8x1xf32>
    %20 = vector.broadcast %19 : vector<8x1xf32> to vector<8x1024xf32>
    %21 = arith.mulf %7, %20 : vector<8x1024xf32>
    %c0_15 = arith.constant 0 : index
    %c0_16 = arith.constant 0 : index
    %c0_17 = arith.constant 0 : index
    %22 = vector.load %arg8[%c0_15, %c0_16, %c0_17] : memref<1x8x1024xf32, #tpu.memory_space<vmem>>, vector<1x8x1024xf32>
    %23 = vector.shape_cast %22 : vector<1x8x1024xf32> to vector<8x1024xf32>
    %24 = vector.shape_cast %21 : vector<8x1024xf32> to vector<1x8x1024xf32>
    tpu.vector_store %arg8[%c0_15, %c0_16, %c0_17], %24 {strides = array<i32>} : memref<1x8x1024xf32, #tpu.memory_space<vmem>>, vector<1x8x1024xf32>,
    return
  }
  func.func @transform_0(%arg0: i32, %arg1: i32) -> (i32, i32, i32) {
    %c0_i32 = arith.constant 0 : i32
    %c0_i32_0 = arith.constant 0 : i32
    return %arg0, %c0_i32, %arg1 : i32, i32, i32
  }
  func.func @transform_1(%arg0: i32, %arg1: i32) -> (i32, i32, i32) {
    %c0_i32 = arith.constant 0 : i32
    %c0_i32_0 = arith.constant 0 : i32
    return %arg0, %c0_i32, %arg1 : i32, i32, i32
  }
  func.func @transform_2(%arg0: i32, %arg1: i32) -> (i32, i32) {
    %c0_i32 = arith.constant 0 : i32
    %c0_i32_0 = arith.constant 0 : i32
    %c0_i32_1 = arith.constant 0 : i32
    return %c0_i32, %c0_i32_0 : i32, i32
  }
  func.func @transform_3(%arg0: i32, %arg1: i32) -> (i32, i32) {
    %c0_i32 = arith.constant 0 : i32
    %c0_i32_0 = arith.constant 0 : i32
    %c0_i32_1 = arith.constant 0 : i32
    return %c0_i32, %c0_i32_0 : i32, i32
  }
  func.func @transform_4(%arg0: i32, %arg1: i32) -> (i32, i32) {
    %c0_i32 = arith.constant 0 : i32
    %c0_i32_0 = arith.constant 0 : i32
    %c0_i32_1 = arith.constant 0 : i32
    return %c0_i32, %c0_i32_0 : i32, i32
  }
  func.func @transform_5(%arg0: i32, %arg1: i32) -> (i32, i32, i32) {
    %c0_i32 = arith.constant 0 : i32
    %c0_i32_0 = arith.constant 0 : i32
    return %arg0, %c0_i32, %arg1 : i32, i32, i32
  }
  func.func @transform_6(%arg0: i32, %arg1: i32) -> (i32, i32, i32) {
    %c0_i32 = arith.constant 0 : i32
    %c0_i32_0 = arith.constant 0 : i32
    return %arg0, %c0_i32, %arg1 : i32, i32, i32
  }
}

</mosaic_0001>

<bundles_post_ra>
// kernel: tpu_custom_call.1
= control target key start
LH: loop header
LB: loop body
LE: loop exit
PB: predicated region body
PF: predicated region fallthrough
CT: control target
= control target key end

     0   :  { %12 = vsyncpa [#allocation3], 0  ;;  %s1820_s0 = inlined_call_operand.vmem [shape: f32[2,25,1024], index: 0, kind: input, shape index: {}]   ;;  %s1821_s1 = inlined_call_operand.vmem [shape: f32[2,25,1024], index: 1, kind: input, shape index: {}]   ;;  %s1822_s2 = inlined_call_operand.vmem [shape: f32[8,25], index: 2, kind: input, shape index: {}]   ;;  %s1823_s3 = inlined_call_operand.vmem [shape: f32[8,1], index: 3, kind: input, shape index: {}]   ;;  %s1824_s4 = inlined_call_operand.vmem [shape: f32[8,1], index: 4, kind: input, shape index: {}]   ;;  %s1825_s5 = inlined_call_operand.hbm [shape: f32[2,8,1024], index: 5, kind: output, shape index: {0}]   ;;  %s1826_s6 = inlined_call_operand.hbm [shape: f32[2,8,1024], index: 6, kind: output, shape index: {1}]  }
   0x1   :  { %14 = vsyncpa [#allocation3 + $0x1], 0 }
   0x2   :  { %15 = vsyncpa [#allocation5], 0 }
   0x3   :  { %17 = vsyncpa [#allocation5 + $0x1], 0  ;;  %s1525_s21 = smov 0   ;;  %s1527_s22 = smov 0  }
   0x4   :  { %s1529_s23 = smov 0   ;;  %s1531_s24 = smov 0  }
   0x5   :  { %s1533_s25 = smov 0   ;;  %s1535_s26 = smov 0  }
   0x6 LB: > { %s1252_s27 = sadd.s32 4294967295, %s1484_s26   ;;  %s1253_s28 = sadd.s32 4294967294, %s1484_s26   ;;  %s1484_s26 = sphi %s1535_s26, %s23_s26   ;;  %s1480_s25 = sphi %s1533_s25, %s1835_s25   ;;  %s1476_s24 = sphi %s1531_s24, %s1834_s24   ;;  %s1472_s23 = sphi %s1529_s23, %s1833_s23   ;;  %s1468_s22 = sphi %s1527_s22, %s1832_s22   ;;  %s1464_s21 = sphi %s1525_s21, %s1831_s21  }
   0x7   : > { %s35_s29 = sadd.s32 1, %s1480_s25  ;;  %s163_s30 = sadd.s32 1, %s1472_s23 }
   0x8   : > { %p37_p0 = scmp.ge.s32.totalorder %s35_s29, 2  ;;  %p173_p1 = scmp.ne.s32.totalorder %s1472_s23, %s1468_s22 }
   0x9   : > { %p174_p2 = scmp.eq.s32.totalorder %s1252_s27, 1  ;;  %p179_p3 = scmp.ne.s32.totalorder %s1468_s22, %s1464_s21 }
   0xa   : > { %s1837_s29 = smov (%p37_p0, %s35_s29), 0  ;;  %p180_p5 = scmp.eq.s32.totalorder %s1253_s28, 1 }
   0xb   : > { %p1565_p4 = por %p174_p2, %p173_p1  ;;  %s158_s8 = ssub.s32 %s1480_s25, %s1837_s29 }
   0xc   : > { %p1256_p6 = scmp.ge.s32.totalorder %s1484_s26, 1  ;;  %p161_p7 = scmp.eq.s32.totalorder %s158_s8, 0 }
   0xd   : > { %p1572_p8 = por %p180_p5, %p179_p3  ;;  %p261_p9 = scmp.lt.s32.totalorder %s1484_s26, 3 }
   0xe   : > { %s1578_s10 = scalar_select %p161_p7, %s1472_s23, %s163_s30  }
   0xf   : > { %p262_p10 = pnand %p1256_p6, %p261_p9 }
  0x10   : > { %p310_p11 = scmp.lt.s32.totalorder (!%p262_p10), %s1476_s24, 1  ;;  %s1717_s11 = sand.u32 (!%p262_p10), 1, %s1468_s22  }
  0x11   : > { %265 = sbr.rel (%p262_p10) target bundleno = 280 (0x118), region = 40  ;;  %s1257_s12 = sshll.u32 (!%p262_p10), %s1717_s11, 6 }
  0x12   : > { %s1091_s19 = scalar_lea.sflag (!%p262_p10), [#allocation5], %s1717_s11  ;;  %s1488_s27 = smov (!%p262_p10), [#allocation4]  }
  0x16   : > { %v1486_v0 = vmov 0.0   ;;  %v1041_v1 = vld [vmem:[%s1823_s3] sm:$0xff]  ;;  %s1587_s13 = scalar_select %p310_p11, %s1476_s24, 1  ;;  %v1487_v2 = vmov 0   ;;  %vm400_vm0 = vcmask 1040384   ;;  %vm396_vm1 = vcmask 203776  }
  0x17   : > { %513 = vmatprep.mubr.f32.mxu0 %v1486_v0  ;;  %584 = vmatprep.mubr.f32.mxu1 %v1486_v0  ;;  %v1620_v19 = vld [vmem:[%s1822_s2] sm:$0xff] }
  0x18   : > { %1361 = vset.pattern.permute.xlu0 %v1487_v2  ;;  %s1295_s14 = sshll.u32 %s1587_s13, 8  ;;  %s1722_s13 = scalar_lea.vmem [#allocation4], %s1257_s12 }
  0x19   : > { %1044 = vperm.xlu0 %1361, %v1041_v1   ;;  %s1595_s17 = scalar_lea.vmem %s1820_s0, %s1295_s14  ;;  %s1649_s28 = scalar_lea.vmem %s1821_s1, %s1295_s14 }
  0x1a   : > { %v356_v3 = vld [vmem:[%s1595_s17 + $0xc8] sm:$0x1]  ;;  %v358_v4 = vld [vmem:[%s1595_s17 + $0xd8] sm:$0x1]  ;;  %v355_v5 = vld [vmem:[%s1595_s17 + $0xc0] sm:$0x1] }
  0x1b   : > { %1263 = vmatprep.subr.msk.mxu0 %vm400_vm0, %v356_v3  ;;  %1266 = vmatprep.subr.msk.mxu1 %vm400_vm0, %v358_v4  ;;  %v357_v6 = vld [vmem:[%s1595_s17 + $0xd0] sm:$0x1]  ;;  %v348_v7 = vld [vmem:[%s1595_s17 + $0x88] sm:$0xff]  ;;  %v350_v8 = vld [vmem:[%s1595_s17 + $0x98] sm:$0xff]  ;;  %s1827_s14 = sshll.u32 %s1476_s24, 10  ;;  %s1123_s15 = sshll.u32 %s1722_s13, 4  ;;  %s1739_s15 = int_to_ptr.vmem [resolvable:$true] %s1123_s15 }
  0x1c   : > { %1264 = vmatpush1.msk.msra.mxu0 %vm400_vm0, %v355_v5  ;;  %1267 = vmatpush1.msk.msra.mxu1 %vm400_vm0, %v357_v6  ;;  %v347_v9 = vld [vmem:[%s1595_s17 + $0x80] sm:$0xff]  ;;  %v349_v10 = vld [vmem:[%s1595_s17 + $0x90] sm:$0xff]  ;;  %v340_v11 = vld [vmem:[%s1595_s17 + $0x48] sm:$0xff]  ;;  %s1737_s18 = scalar_lea.hbm %s1826_s6, %s1827_s14  ;;  %s1378_s20 = scalar_lea.vmem %s1739_s15, 1024 }
  0x1d   : > { %475 = vmatprep.subr.mxu0 %v348_v7  ;;  %546 = vmatprep.subr.mxu1 %v350_v8  ;;  %v342_v12 = vld [vmem:[%s1595_s17 + $0x58] sm:$0xff]  ;;  %v339_v13 = vld [vmem:[%s1595_s17 + $0x40] sm:$0xff]  ;;  %v341_v14 = vld [vmem:[%s1595_s17 + $0x50] sm:$0xff]  ;;  %p1379_p12 = scmp.ne.s32.totalorder %s1739_s15, %s1378_s20 }
  0x1e   : > { %476 = vmatpush1.msra.mxu0 %v347_v9  ;;  %547 = vmatpush1.msra.mxu1 %v349_v10  ;;  %v332_v15 = vld [vmem:[%s1595_s17 + $0x8] sm:$0xff]  ;;  %v334_v16 = vld [vmem:[%s1595_s17 + $0x18] sm:$0xff]  ;;  %v331_v17 = vld [vmem:[%s1595_s17] sm:$0xff] }
  0x1f   : > { %477 = vmatprep.subr.mxu0 %v340_v11  ;;  %548 = vmatprep.subr.mxu1 %v342_v12  ;;  %v333_v18 = vld [vmem:[%s1595_s17 + $0x10] sm:$0xff]  ;;  %v360_v20 = vld [vmem:[%s1595_s17 + $0xe8] sm:$0x1]  ;;  %v362_v21 = vld [vmem:[%s1595_s17 + $0xf8] sm:$0x1]  ;;  %p1380_p13 = pnand %p1379_p12, %p1565_p4 }
  0x20   : > { %478 = vmatpush1.msra.mxu0 %v339_v13  ;;  %549 = vmatpush1.msra.mxu1 %v341_v14  ;;  %v359_v22 = vld [vmem:[%s1595_s17 + $0xe0] sm:$0x1]  ;;  %v361_v23 = vld [vmem:[%s1595_s17 + $0xf0] sm:$0x1]  ;;  %v352_v24 = vld [vmem:[%s1595_s17 + $0xa8] sm:$0xff] }
  0x21   : > { %479 = vmatprep.subr.mxu0 %v332_v15  ;;  %550 = vmatprep.subr.mxu1 %v334_v16  ;;  %v354_v25 = vld [vmem:[%s1595_s17 + $0xb8] sm:$0xff]  ;;  %v351_v26 = vld [vmem:[%s1595_s17 + $0xa0] sm:$0xff]  ;;  %v353_v27 = vld [vmem:[%s1595_s17 + $0xb0] sm:$0xff]  ;;  %p1381_p0 = pneg %p1380_p13 }
  0x22   : > { %480 = vmatpush1.msra.mxu0 %v331_v17  ;;  %551 = vmatpush1.msra.mxu1 %v333_v18  ;;  %v344_v28 = vld [vmem:[%s1595_s17 + $0x68] sm:$0xff]  ;;  %v346_v29 = vld [vmem:[%s1595_s17 + $0x78] sm:$0xff]  ;;  %v343_v30 = vld [vmem:[%s1595_s17 + $0x60] sm:$0xff] }
  0x23   : > { %1265 = vmatmul.mubr.msk.f32.vlgmr.msra.gmra.mxu0 %vm396_vm1, %v1620_v19  ;;  %1268 = vmatmul.mubr.msk.f32.vlgmr.msra.gmra.mxu1 %vm396_vm1, %v1620_v19  ;;  %v345_v31 = vld [vmem:[%s1595_s17 + $0x70] sm:$0xff]  ;;  %v336_v32 = vld [vmem:[%s1595_s17 + $0x28] sm:$0xff]  ;;  %v338_v33 = vld [vmem:[%s1595_s17 + $0x38] sm:$0xff] }
  0x24   : > { %1269 = vmatprep.subr.msk.mxu0 %vm400_vm0, %v360_v20  ;;  %1272 = vmatprep.subr.msk.mxu1 %vm400_vm0, %v362_v21  ;;  %v335_v34 = vld [vmem:[%s1595_s17 + $0x20] sm:$0xff]  ;;  %v337_v35 = vld [vmem:[%s1595_s17 + $0x30] sm:$0xff]  ;;  %v388_v36 = vld [vmem:[%s1649_s28 + $0xc8] sm:$0x1] }
  0x25   : > { %1270 = vmatpush1.msk.msra.mxu0 %vm400_vm0, %v359_v22  ;;  %1273 = vmatpush1.msk.msra.mxu1 %vm400_vm0, %v361_v23  ;;  %v390_v37 = vld [vmem:[%s1649_s28 + $0xd8] sm:$0x1]  ;;  %v387_v38 = vld [vmem:[%s1649_s28 + $0xc0] sm:$0x1]  ;;  %v389_v39 = vld [vmem:[%s1649_s28 + $0xd0] sm:$0x1] }
  0x26   : > { %617 = vmatprep.subr.mxu0 %v352_v24  ;;  %688 = vmatprep.subr.mxu1 %v354_v25  ;;  %v380_v40 = vld [vmem:[%s1649_s28 + $0x88] sm:$0xff]  ;;  %v382_v41 = vld [vmem:[%s1649_s28 + $0x98] sm:$0xff]  ;;  %v379_v42 = vld [vmem:[%s1649_s28 + $0x80] sm:$0xff] }
  0x27   : > { %618 = vmatpush1.msra.mxu0 %v351_v26  ;;  %689 = vmatpush1.msra.mxu1 %v353_v27  ;;  %v381_v43 = vld [vmem:[%s1649_s28 + $0x90] sm:$0xff]  ;;  %v372_v44 = vld [vmem:[%s1649_s28 + $0x48] sm:$0xff]  ;;  %v374_v45 = vld [vmem:[%s1649_s28 + $0x58] sm:$0xff] }
  0x28   : > { %619 = vmatprep.subr.mxu0 %v344_v28  ;;  %690 = vmatprep.subr.mxu1 %v346_v29  ;;  %v371_v46 = vld [vmem:[%s1649_s28 + $0x40] sm:$0xff]  ;;  %v373_v47 = vld [vmem:[%s1649_s28 + $0x50] sm:$0xff]  ;;  %v364_v48 = vld [vmem:[%s1649_s28 + $0x8] sm:$0xff] }
  0x29   : > { %620 = vmatpush1.msra.mxu0 %v343_v30  ;;  %691 = vmatpush1.msra.mxu1 %v345_v31  ;;  %v366_v49 = vld [vmem:[%s1649_s28 + $0x18] sm:$0xff]  ;;  %v363_v50 = vld [vmem:[%s1649_s28] sm:$0xff]  ;;  %v365_v51 = vld [vmem:[%s1649_s28 + $0x10] sm:$0xff] }
  0x2a   : > { %621 = vmatprep.subr.mxu0 %v336_v32  ;;  %692 = vmatprep.subr.mxu1 %v338_v33  ;;  %v392_v52 = vld [vmem:[%s1649_s28 + $0xe8] sm:$0x1]  ;;  %v394_v53 = vld [vmem:[%s1649_s28 + $0xf8] sm:$0x1]  ;;  %v391_v54 = vld [vmem:[%s1649_s28 + $0xe0] sm:$0x1] }
  0x2b   : > { %622 = vmatpush1.msra.mxu0 %v335_v34  ;;  %655 = vmatprep.mubr.f32.mxu0 %v1486_v0  ;;  %v393_v55 = vld [vmem:[%s1649_s28 + $0xf0] sm:$0x1]  ;;  %v384_v56 = vld [vmem:[%s1649_s28 + $0xa8] sm:$0xff]  ;;  %v386_v57 = vld [vmem:[%s1649_s28 + $0xb8] sm:$0xff] }
  0x2c   : > { %693 = vmatpush1.msra.mxu1 %v337_v35  ;;  %726 = vmatprep.mubr.f32.mxu1 %v1486_v0  ;;  %v383_v58 = vld [vmem:[%s1649_s28 + $0xa0] sm:$0xff]  ;;  %v385_v59 = vld [vmem:[%s1649_s28 + $0xb0] sm:$0xff]  ;;  %v376_v60 = vld [vmem:[%s1649_s28 + $0x68] sm:$0xff] }
  0x2d   : > { %1271 = vmatmul.mubr.msk.f32.vlgmr.msra.gmra.mxu0 %vm396_vm1, %v1620_v19  ;;  %1274 = vmatmul.mubr.msk.f32.vlgmr.msra.gmra.mxu1 %vm396_vm1, %v1620_v19  ;;  %v378_v61 = vld [vmem:[%s1649_s28 + $0x78] sm:$0xff]  ;;  %v375_v62 = vld [vmem:[%s1649_s28 + $0x60] sm:$0xff]  ;;  %v377_v63 = vld [vmem:[%s1649_s28 + $0x70] sm:$0xff] }
  0x2e   : > { %1275 = vmatprep.subr.msk.mxu0 %vm400_vm0, %v388_v36  ;;  %1278 = vmatprep.subr.msk.mxu1 %vm400_vm0, %v390_v37  ;;  %v368_v1 = vld [vmem:[%s1649_s28 + $0x28] sm:$0xff]  ;;  %v370_v2 = vld [vmem:[%s1649_s28 + $0x38] sm:$0xff]  ;;  %v367_v3 = vld [vmem:[%s1649_s28 + $0x20] sm:$0xff] }
  0x2f   : > { %1276 = vmatpush1.msk.msra.mxu0 %vm400_vm0, %v387_v38  ;;  %1279 = vmatpush1.msk.msra.mxu1 %vm400_vm0, %v389_v39  ;;  %v369_v4 = vld [vmem:[%s1649_s28 + $0x30] sm:$0xff]  ;;  %v1063_v5 = vld [vmem:[%s1824_s4] sm:$0xff]  ;;  %s1382_s28 = sshll.u32 %s1488_s27, 4  ;;  %s1383_s28 = int_to_ptr.vmem [resolvable:$false] %s1382_s28 }
  0x30   : > { %759 = vmatprep.subr.mxu0 %v380_v40  ;;  %830 = vmatprep.subr.mxu1 %v382_v41  ;;  %s1384_s30 = scalar_lea.vmem %s1383_s28, 2048  ;;  %p1385_p1 = scmp.lt.s32.totalorder %s1739_s15, %s1383_s28 }
  0x31   : > { %760 = vmatpush1.msra.mxu0 %v379_v42  ;;  %831 = vmatpush1.msra.mxu1 %v381_v43  ;;  %p1386_p2 = scmp.lt.s32.totalorder %s1384_s30, %s1378_s20 }
  0x32   : > { %761 = vmatprep.subr.mxu0 %v372_v44  ;;  %832 = vmatprep.subr.mxu1 %v374_v45 }
  0x33   : > { %762 = vmatpush1.msra.mxu0 %v371_v46  ;;  %833 = vmatpush1.msra.mxu1 %v373_v47  ;;  %p1387_p3 = por %p1386_p2, %p1385_p1 }
  0x34   : > { %763 = vmatprep.subr.mxu0 %v364_v48  ;;  %834 = vmatprep.subr.mxu1 %v366_v49 }
  0x35   : > { %764 = vmatpush1.msra.mxu0 %v363_v50  ;;  %797 = vmatprep.mubr.f32.mxu0 %v1486_v0  ;;  %p1388_p5 = pnand %p1387_p3, %p1381_p0 }
  0x36   : > { %835 = vmatpush1.msra.mxu1 %v365_v51  ;;  %868 = vmatprep.mubr.f32.mxu1 %v1486_v0 }
  0x37   : > { %1277 = vmatmul.mubr.msk.f32.vlgmr.msra.gmra.mxu0 %vm396_vm1, %v1620_v19  ;;  %1280 = vmatmul.mubr.msk.f32.vlgmr.msra.gmra.mxu1 %vm396_vm1, %v1620_v19 }
  0x38   : > { %1281 = vmatprep.subr.msk.mxu0 %vm400_vm0, %v392_v52  ;;  %1284 = vmatprep.subr.msk.mxu1 %vm400_vm0, %v394_v53 }
  0x39   : > { %1282 = vmatpush1.msk.msra.mxu0 %vm400_vm0, %v391_v54  ;;  %1285 = vmatpush1.msk.msra.mxu1 %vm400_vm0, %v393_v55 }
  0x3a   : > { %901 = vmatprep.subr.mxu0 %v384_v56  ;;  %972 = vmatprep.subr.mxu1 %v386_v57 }
  0x3b   : > { %902 = vmatpush1.msra.mxu0 %v383_v58  ;;  %973 = vmatpush1.msra.mxu1 %v385_v59 }
  0x3c   : > { %903 = vmatprep.subr.mxu0 %v376_v60  ;;  %974 = vmatprep.subr.mxu1 %v378_v61 }
  0x3d   : > { %904 = vmatpush1.msra.mxu0 %v375_v62  ;;  %975 = vmatpush1.msra.mxu1 %v377_v63 }
  0x3e   : > { %905 = vmatprep.subr.mxu0 %v368_v1  ;;  %976 = vmatprep.subr.mxu1 %v370_v2 }
  0x3f   : > { %906 = vmatpush1.msra.mxu0 %v367_v3  ;;  %939 = vmatprep.mubr.f32.mxu0 %v1486_v0 }
  0x40   : > { %977 = vmatpush1.msra.mxu1 %v369_v4  ;;  %1010 = vmatprep.mubr.f32.mxu1 %v1486_v0 }
  0x41   : > { %1283 = vmatmul.mubr.msk.f32.vlgmr.msra.gmra.mxu0 %vm396_vm1, %v1620_v19  ;;  %1286 = vmatmul.mubr.msk.f32.vlgmr.msra.gmra.mxu1 %vm396_vm1, %v1620_v19 }
  0x42   : > { %1066 = vperm.xlu0 %1361, %v1063_v5  }
  0x94   : > { %v1714_v6 = vpop.permute.xlu0 %1044 }
  0xbd   : > { %v1067_v7 = vpop.permute.xlu0 %1066 }
  0xe3   : > { %v515_v8 = vpop.f32.mrf.mxu0  ;;  %v586_v9 = vpop.f32.mrf.mxu1 }
  0xe4   : > { %v1017_v10 = vadd.f32 1e-20, %v515_v8  ;;  %v1019_v11 = vadd.f32 1e-20, %v586_v9  ;;  %v1069_v0 = vmul.f32 %v1067_v7, %v515_v8  ;;  %v1071_v12 = vmul.f32 %v1067_v7, %v586_v9 }
  0xe5   : > { %v517_v13 = vpop.f32.mrf.mxu0  ;;  %v588_v14 = vpop.f32.mrf.mxu1 }
  0xe6   : > { %1077 = vst [vmem:[%s1722_s13] sm:$0xff] %v1069_v0  ;;  %1079 = vst [vmem:[%s1722_s13 + $0x10] sm:$0xff] %v1071_v12  ;;  %v1018_v15 = vadd.f32 1e-20, %v517_v13  ;;  %v1070_v16 = vmul.f32 %v1067_v7, %v517_v13  ;;  %v1020_v17 = vadd.f32 1e-20, %v588_v14  ;;  %1362 = vrcp.f32 %v1017_v10 }
  0xe7   : > { %v1072_v18 = vmul.f32 %v1067_v7, %v588_v14  ;;  %1364 = vrcp.f32 %v1019_v11 }
  0xe8   : > { %1078 = vst [vmem:[%s1722_s13 + $0x8] sm:$0xff] %v1070_v16  ;;  %1366 = vrcp.f32 %v1018_v15 }
  0xe9   : > { %1080 = vst [vmem:[%s1722_s13 + $0x18] sm:$0xff] %v1072_v18  ;;  %1368 = vrcp.f32 %v1020_v17 }
  0xed   : > { %v657_v19 = vpop.f32.mrf.mxu0  ;;  %v728_v20 = vpop.f32.mrf.mxu1 }
  0xee   : > { %v1021_v21 = vadd.f32 1e-20, %v657_v19  ;;  %v1073_v22 = vmul.f32 %v1067_v7, %v657_v19  ;;  %v1023_v23 = vadd.f32 1e-20, %v728_v20  ;;  %v1075_v24 = vmul.f32 %v1067_v7, %v728_v20 }
  0xef   : > { %v659_v25 = vpop.f32.mrf.mxu0  ;;  %v730_v26 = vpop.f32.mrf.mxu1 }
  0xf0   : > { %1081 = vst [vmem:[%s1722_s13 + $0x20] sm:$0xff] %v1073_v22  ;;  %1083 = vst [vmem:[%s1722_s13 + $0x30] sm:$0xff] %v1075_v24  ;;  %v1022_v27 = vadd.f32 1e-20, %v659_v25  ;;  %v1074_v28 = vmul.f32 %v1067_v7, %v659_v25  ;;  %v1024_v29 = vadd.f32 1e-20, %v730_v26  ;;  %1370 = vrcp.f32 %v1021_v21 }
  0xf1   : > { %v1076_v30 = vmul.f32 %v1067_v7, %v730_v26  ;;  %1372 = vrcp.f32 %v1023_v23 }
  0xf2   : > { %1082 = vst [vmem:[%s1722_s13 + $0x28] sm:$0xff] %v1074_v28  ;;  %1374 = vrcp.f32 %v1022_v27 }
  0xf3   : > { %1084 = vst [vmem:[%s1722_s13 + $0x38] sm:$0xff] %v1076_v30  ;;  %v1363_v31 = vpop.eup %1362  ;;  %1376 = vrcp.f32 %v1024_v29 }
  0xf4   : > { %1391 = shalt.err (!%p1388_p5)
}
  0xf5   : > { %s1392_s8 = scalar_lea.hbm %s1737_s18, 1024  ;;  %s1396_s17 = scalar_lea.hbm %s1826_s6, 2048 }
  0xf6   : > { %p1393_p6 = scmp.ne.s32.totalorder %s1737_s18, %s1392_s8  ;;  %p1397_p10 = scmp.lt.s32.totalorder %s1737_s18, %s1826_s6 }
  0xf7   : > { %p1398_p11 = scmp.lt.s32.totalorder %s1396_s17, %s1392_s8 }
  0xf8   : > { %p1394_p7 = pnand %p1393_p6, %p1565_p4 }
  0xf9   : > { %p1399_p12 = por %p1398_p11, %p1397_p10 }
  0xfa   : > { %p1395_p9 = pneg %p1394_p7 }
  0xfc   : > { %p1400_p13 = pnand %p1399_p12, %p1395_p9 }
  0xfe   : > { %1403 = shalt.err (!%p1400_p13)
}
  0xff   : > { %1300 = dma.vmem_to_hbm [thread:$0]  (%p1565_p4), %s1739_s15, 1024, %s1737_s18, %s1091_s19   ;;  %v1365_v32 = vpop.eup %1364  ;;  %v799_v35 = vpop.f32.mrf.mxu0 }
 0x100   : > { %v1367_v33 = vpop.eup %1366  ;;  %v870_v36 = vpop.f32.mrf.mxu1  ;;  %v1033_v37 = vmul.f32 %v1363_v31, %v799_v35  ;;  %s301_s14 = scalar_lea.vmem [#allocation2], %s1257_s12  ;;  %s1830_s15 = sshll.u32 %s1476_s24, 10 }
 0x101   : > { %v1369_v34 = vpop.eup %1368  ;;  %v1035_v38 = vmul.f32 %v1365_v32, %v870_v36  ;;  %v801_v39 = vpop.f32.mrf.mxu0  ;;  %s1107_s12 = sshll.u32 %s301_s14, 4  ;;  %s1779_s20 = scalar_lea.hbm %s1825_s5, %s1830_s15  ;;  %s1108_s12 = int_to_ptr.vmem [resolvable:$true] %s1107_s12 }
 0x102   : > { %v872_v40 = vpop.f32.mrf.mxu1  ;;  %v1047_v41 = vadd.f32 %v1714_v6, %v1033_v37  ;;  %v1034_v43 = vmul.f32 %v1367_v33, %v801_v39  ;;  %v1371_v47 = vpop.eup %1370  ;;  %s1086_s28 = scalar_lea.sflag [#allocation3], %s1717_s11  ;;  %s1404_s30 = scalar_lea.vmem %s1108_s12, 1024 }
 0x103   : > { %v1049_v42 = vadd.f32 %v1714_v6, %v1035_v38  ;;  %v1036_v44 = vmul.f32 %v1369_v34, %v872_v40  ;;  %v1373_v48 = vpop.eup %1372  ;;  %v941_v51 = vpop.f32.mrf.mxu0  ;;  %p1405_p0 = scmp.ne.s32.totalorder %s1108_s12, %s1404_s30  ;;  %s1489_s8 = smov [#allocation2]  }
 0x104   : > { %1055 = vst [vmem:[%s301_s14] sm:$0xff] %v1047_v41  ;;  %v1048_v45 = vadd.f32 %v1714_v6, %v1034_v43  ;;  %v1375_v49 = vpop.eup %1374  ;;  %v1012_v52 = vpop.f32.mrf.mxu1  ;;  %v1037_v53 = vmul.f32 %v1371_v47, %v941_v51  ;;  %s1408_s13 = sshll.u32 %s1489_s8, 4  ;;  %s1409_s13 = int_to_ptr.vmem [resolvable:$false] %s1408_s13 }
 0x105   : > { %1057 = vst [vmem:[%s301_s14 + $0x10] sm:$0xff] %v1049_v42  ;;  %v1050_v46 = vadd.f32 %v1714_v6, %v1036_v44  ;;  %v1377_v50 = vpop.eup %1376  ;;  %v1039_v54 = vmul.f32 %v1373_v48, %v1012_v52  ;;  %v943_v55 = vpop.f32.mrf.mxu0  ;;  %p1406_p1 = pnand %p1405_p0, %p1565_p4  ;;  %s1410_s16 = scalar_lea.vmem %s1409_s13, 2048 }
 0x106   : > { %1056 = vst [vmem:[%s301_s14 + $0x8] sm:$0xff] %v1048_v45  ;;  %v1014_v56 = vpop.f32.mrf.mxu1  ;;  %v1051_v57 = vadd.f32 %v1714_v6, %v1037_v53  ;;  %v1038_v59 = vmul.f32 %v1375_v49, %v943_v55  ;;  %p1411_p3 = scmp.lt.s32.totalorder %s1108_s12, %s1409_s13  ;;  %p1412_p5 = scmp.lt.s32.totalorder %s1410_s16, %s1404_s30 }
 0x107   : > { %1058 = vst [vmem:[%s301_s14 + $0x18] sm:$0xff] %v1050_v46  ;;  %v1053_v58 = vadd.f32 %v1714_v6, %v1039_v54  ;;  %v1040_v60 = vmul.f32 %v1377_v50, %v1014_v56  ;;  %p1407_p2 = pneg %p1406_p1 }
 0x108   : > { %1059 = vst [vmem:[%s301_s14 + $0x20] sm:$0xff] %v1051_v57  ;;  %v1052_v61 = vadd.f32 %v1714_v6, %v1038_v59  ;;  %p1413_p6 = por %p1412_p5, %p1411_p3 }
 0x109   : > { %1061 = vst [vmem:[%s301_s14 + $0x30] sm:$0xff] %v1053_v58  ;;  %v1054_v62 = vadd.f32 %v1714_v6, %v1040_v60 }
 0x10a   : > { %1060 = vst [vmem:[%s301_s14 + $0x28] sm:$0xff] %v1052_v61  ;;  %p1414_p7 = pnand %p1413_p6, %p1407_p2 }
 0x10b   : > { %1062 = vst [vmem:[%s301_s14 + $0x38] sm:$0xff] %v1054_v62 }
 0x10c   : > { %1417 = shalt.err (!%p1414_p7)
}
 0x10d   : > { %s1418_s24 = scalar_lea.hbm %s1779_s20, 1024  ;;  %s1422_s27 = scalar_lea.hbm %s1825_s5, 2048 }
 0x10e   : > { %p1419_p9 = scmp.ne.s32.totalorder %s1779_s20, %s1418_s24  ;;  %p1423_p12 = scmp.lt.s32.totalorder %s1779_s20, %s1825_s5 }
 0x10f   : > { %p1424_p13 = scmp.lt.s32.totalorder %s1422_s27, %s1418_s24 }
 0x110   : > { %p1420_p10 = pnand %p1419_p9, %p1565_p4 }
 0x111   : > { %p1425_p0 = por %p1424_p13, %p1423_p12 }
 0x112   : > { %p1421_p11 = pneg %p1420_p10 }
 0x114   : > { %p1426_p1 = pnand %p1425_p0, %p1421_p11 }
 0x116   : > { %1429 = shalt.err (!%p1426_p1)
}
 0x117   : > { %1299 = dma.vmem_to_hbm [thread:$0]  (%p1565_p4), %s1108_s12, 1024, %s1779_s20, %s1086_s28  }
 0x118 PF: > { %p1310_p2 = scmp.ge.s32.totalorder %s1484_s26, 2  ;;  %s1135_s18 = sand.u32 1, %s1464_s21  }
 0x119   : > { %s1136_s19 = scalar_lea.sflag [#allocation3], %s1135_s18 }
 0x11a   : > { %p1304_p3 = pnand %p1310_p2, %p1572_p8 }
 0x11c   : > { %p1305_p5 = pneg %p1304_p3 }
 0x11e   : > { %1455 = dma.done.wait (%p1305_p5), %s1136_s19, 1024  }
 0x11f   : > { %1457 = vsyncadd (%p1305_p5), %s1136_s19, 4294966272  ;;  %s1145_s30 = scalar_lea.sflag [#allocation5], %s1135_s18 }
 0x120   : > { %1459 = dma.done.wait (%p1305_p5), %s1145_s30, 1024  }
 0x121   : > { %1461 = vsyncadd (%p1305_p5), %s1145_s30, 4294966272  ;;  %s23_s26 = sadd.s32 1, %s1484_s26   ;;  %s1831_s21 = smov %s1468_s22 }
 0x122   : > { %p20_p6 = scmp.ge.s32.totalorder %s23_s26, 4   ;;  %s1832_s22 = smov %s1472_s23 }
 0x123   : > { %s1833_s23 = smov %s1578_s10  ;;  %s1834_s24 = smov %s1480_s25 }
 0x124   : > { %s1835_s25 = smov %s1837_s29  ;;  %22 = sbr.rel (!%p20_p6) target bundleno = 6 (0x6), region = 95 }
 0x129   :  { %1150 = vsyncpa [#allocation3], 1 }
 0x12a   :  { %1152 = vsyncpa [#allocation3 + $0x1], 1 }
 0x12b   :  { %1153 = vsyncpa [#allocation5], 1 }
 0x12c   :  { %1155 = vsyncpa [#allocation5 + $0x1], 1 }

</bundles_post_ra>
